<compile_context>
chip_gen: v5e
topology: v5e:2x2
jax: 0.10.0
libtpu: 0.0.40
codegen_flags: <defaults>
</compile_context>

<pallas_src>
import functools

import jax
import jax.numpy as jnp
from jax.experimental import pallas as pl
from jax.experimental.pallas import tpu as pltpu


def _causal_conv1d_kernel(x_ref, w_ref, b_ref, o_ref, win_ref, *,
                          dilation, taps, pad, carry_halo, use_im2col):
    # x_ref  : (1, C_in, TL)         stream-dtype tile of one batch element
    # w_ref  : (C_out, K*C_in)       fused weights, resident in VMEM
    # b_ref  : (C_out, 1)            f32 bias, resident in VMEM
    # o_ref  : (1, C_out, TL)
    # win_ref: (C_in, TL + max(P,1)) persistent sliding window [halo | tile]
    TL = o_ref.shape[2]
    C_in = x_ref.shape[1]
    C_out = o_ref.shape[1]
    x_tile = x_ref[0]                                       # (C_in, TL)

    if pad > 0:
        if carry_halo:
            t = pl.program_id(1)

            @pl.when(t == 0)
            def _():
                # First L-tile of every batch: the causal left pad is zeros.
                win_ref[:, :pad] = jnp.zeros((C_in, pad), win_ref.dtype)

            @pl.when(t != 0)
            def _():
                # Carry the last P input columns of the previous tile.
                # Safe for a partial/garbage tail on the last tile of a batch
                # only because the grid iterates L-tiles innermost: the very
                # next step is t==0 of the next batch, which re-zeros [:, :P].
                win_ref[:, :pad] = win_ref[:, TL:TL + pad]
        else:
            win_ref[:, :pad] = jnp.zeros((C_in, pad), win_ref.dtype)
        win_ref[:, pad:pad + TL] = x_tile

        def tap(k):
            return win_ref[:, k * dilation:k * dilation + TL]
    else:
        # pad == 0  <=>  K == 1: the single tap is just the current tile.
        def tap(k):
            return x_tile

    if use_im2col and taps > 1:
        # Tiny C_in: stack the K dilated taps along the contraction dim so the
        # MXU sees one (C_out, K*C_in) x (K*C_in, TL) matmul.
        xs = jnp.concatenate([tap(k) for k in range(taps)], axis=0)
        acc = jnp.dot(w_ref[...], xs, preferred_element_type=jnp.float32)
    else:
        # K accumulating matmuls: identical MXU FLOPs, no K*C_in*TL temp.
        acc = jnp.zeros((C_out, TL), jnp.float32)
        for k in range(taps):
            acc = acc + jnp.dot(w_ref[:, k * C_in:(k + 1) * C_in], tap(k),
                                preferred_element_type=jnp.float32)

    o_ref[0] = (acc + b_ref[...]).astype(o_ref.dtype)


def causal_conv1d(x, weight, bias, *, stride=1, dilation=1, l_tile=1024,
                  stream_dtype=jnp.bfloat16, im2col_cin_threshold=64,
                  x_buffer_count=None, out_dtype=None):
    """Causal conv1d matching CausalConv1d.forward (stride=1 only)."""
    assert stride == 1, "only stride=1 supported"
    N, C_in, L = x.shape
    C_out, C_in_w, K = weight.shape
    assert C_in == C_in_w
    P = (K - 1) * dilation

    stream_dtype = jnp.dtype(stream_dtype)
    out_dtype = jnp.dtype(out_dtype) if out_dtype is not None else x.dtype

    # Narrow-dtype streaming with f32 accumulation (feedback item 1).
    x_s = x.astype(stream_dtype)
    # Fuse the K taps into the contraction dim: w_fused[co, k*C_in + ci].
    w_fused = (jnp.transpose(weight, (0, 2, 1))
               .reshape(C_out, K * C_in).astype(stream_dtype))
    bias2d = bias.reshape(C_out, 1).astype(jnp.float32)

    use_im2col = C_in < im2col_cin_threshold

    itemsize = stream_dtype.itemsize
    out_itemsize = jnp.dtype(out_dtype).itemsize

    # Generation-aware VMEM budget: ~48 MiB on v7x (64 MiB/TC), ~96 MiB on
    # v5e/v6e (128 MiB).  Conservative 64 MiB fallback if the query fails.
    try:
        vmem_cap = int(getattr(pltpu.get_tpu_info(), "vmem_capacity_bytes",
                               64 << 20))
    except Exception:  # pragma: no cover - off-TPU tracing fallback
        vmem_cap = 64 << 20
    budget = (vmem_cap * 3) // 4

    def step_vmem(tl):
        v = 2 * C_in * tl * itemsize                 # x tiles (double buffer)
        v += 2 * C_out * tl * out_itemsize           # out tiles (double buffer)
        v += C_in * (tl + max(P, 1)) * itemsize      # sliding-window scratch
        v += C_out * K * C_in * itemsize + C_out * 4  # resident weights + bias
        v += C_out * tl * 4                          # f32 accumulator
        if use_im2col and K > 1:
            v += K * C_in * tl * itemsize            # im2col operand temp
        return v

    # Sequence tiling: full L for small sequences, lane-aligned tiles sized to
    # the per-generation VMEM budget otherwise (feedback items 3 & 4).
    if L <= l_tile:
        TL, n_l = L, 1
    else:
        assert l_tile % 128 == 0, "l_tile must be a multiple of 128"
        TL = l_tile
        while TL > 128 and step_vmem(TL) > budget:
            TL -= 128
        assert TL >= P, "l_tile must cover the receptive-field halo"
        n_l = pl.cdiv(L, TL)
    carry_halo = (n_l > 1) and (P > 0)

    vmem_limit = int(min(max(step_vmem(TL) + (4 << 20), 16 << 20), budget))

    kernel = functools.partial(
        _causal_conv1d_kernel, dilation=dilation, taps=K, pad=P,
        carry_halo=carry_halo, use_im2col=use_im2col)

    cost = pl.CostEstimate(
        flops=2 * N * C_out * C_in * K * L,
        transcendentals=0,
        bytes_accessed=(N * C_in * L * itemsize
                        + N * C_out * L * out_itemsize
                        + C_out * K * C_in * itemsize + C_out * 4))

    x_spec_kwargs = {}
    if x_buffer_count is not None:
        # Optional deeper input buffering for tiny-channel shapes (item 9).
        x_spec_kwargs["pipeline_mode"] = pl.Buffered(x_buffer_count)

    return pl.pallas_call(
        kernel,
        out_shape=jax.ShapeDtypeStruct((N, C_out, L), out_dtype),
        grid_spec=pltpu.PrefetchScalarGridSpec(
            num_scalar_prefetch=0,
            grid=(N, n_l),  # L-tiles innermost: weights never re-DMA'd,
                            # and the halo chain is re-seeded at t==0.
            in_specs=[
                pl.BlockSpec((1, C_in, TL), lambda b, t: (b, 0, t),
                             **x_spec_kwargs),
                pl.BlockSpec((C_out, K * C_in), lambda b, t: (0, 0)),
                pl.BlockSpec((C_out, 1), lambda b, t: (0, 0)),
            ],
            out_specs=pl.BlockSpec((1, C_out, TL), lambda b, t: (b, 0, t)),
            scratch_shapes=[
                pltpu.VMEM((C_in, TL + max(P, 1)), stream_dtype)],
        ),
        compiler_params=pltpu.CompilerParams(
            dimension_semantics=(
                "parallel", "arbitrary" if carry_halo else "parallel"),
            vmem_limit_bytes=vmem_limit,
        ),
        cost_estimate=cost,
    )(x_s, w_fused, bias2d)


def _reference_causal_conv1d(x, weight, bias, *, dilation=1):
    """Pure-JAX reference mirroring nn.Conv1d(pad=(K-1)*d) then right-crop."""
    K = weight.shape[2]
    P = (K - 1) * dilation
    out = jax.lax.conv_general_dilated(
        x, weight,
        window_strides=(1,),
        padding=[(P, P)],
        rhs_dilation=(dilation,),
        dimension_numbers=("NCH", "OIH", "NCH"),
        precision=jax.lax.Precision.HIGHEST,
    )
    out = out + bias.reshape(1, -1, 1)
    return out[:, :, :-P] if P != 0 else out


def _run_case(key, N, C_in, C_out, L, K, dilation, l_tile,
              stream_dtype=jnp.bfloat16):
    kx, kw, kb = jax.random.split(key, 3)
    x = jax.random.normal(kx, (N, C_in, L), dtype=jnp.float32)
    fan_in = C_in * K
    bound = 1.0 / (fan_in ** 0.5)
    weight = jax.random.uniform(kw, (C_out, C_in, K), jnp.float32, -bound, bound)
    bias = jax.random.uniform(kb, (C_out,), jnp.float32, -bound, bound)

    out = causal_conv1d(x, weight, bias, dilation=dilation, l_tile=l_tile,
                        stream_dtype=stream_dtype)
    out = jax.block_until_ready(out)

    if jnp.dtype(stream_dtype) == jnp.float32:
        x_ref, w_ref, atol = x, weight, 1e-4
    else:
        # Compare against the f32 reference evaluated on the *rounded* inputs:
        # products of bf16 values are exact in f32, so only accumulation-order
        # differences remain.
        x_ref = x.astype(stream_dtype).astype(jnp.float32)
        w_ref = weight.astype(stream_dtype).astype(jnp.float32)
        atol = 2e-3
    ref = _reference_causal_conv1d(x_ref, w_ref, bias, dilation=dilation)

    assert out.shape == (N, C_out, L)
    err = jnp.max(jnp.abs(out.astype(jnp.float32) - ref))
    assert err <= atol, f"mismatch: max abs err {err} (atol={atol})"


if __name__ == "__main__":
    key = jax.random.PRNGKey(0)
    k1, k2, k3, k4 = jax.random.split(key, 4)

    # Small shapes consistent with the module's forward (N, C_in, L):
    # exact-f32 path, single sequence tile (L <= l_tile).
    _run_case(k1, N=2, C_in=4, C_out=8, L=16, K=3, dilation=2, l_tile=1024,
              stream_dtype=jnp.float32)

    # bf16 streaming, multi-tile path: lane-aligned 128-wide L tiles with the
    # persistent sliding-window halo scratch (tiny C_in -> im2col path).
    _run_case(k2, N=2, C_in=4, C_out=8, L=384, K=3, dilation=2, l_tile=128)

    # Non-divisible L: partial edge tile (padded reads only feed dropped
    # columns; halo invariant re-zeroed at t==0 of the next batch).
    _run_case(k3, N=2, C_in=4, C_out=8, L=200, K=5, dilation=1, l_tile=128)

    # C_in >= 64: exercises the K-accumulating-matmul path (no im2col temp).
    _run_case(k4, N=1, C_in=64, C_out=64, L=256, K=3, dilation=1, l_tile=128)

    print("KERNEL_OK")
</pallas_src>

<mosaic_0001>
module attributes {stable_mosaic.version = 11 : i64} {
  func.func @_causal_conv1d_kernel(%arg0: i32, %arg1: i32, %arg2: memref<1x4x16xf32, #tpu.memory_space<vmem>>, %arg3: memref<8x12xf32, #tpu.memory_space<vmem>>, %arg4: memref<8x1xf32, #tpu.memory_space<vmem>>, %arg5: memref<1x8x16xf32, #tpu.memory_space<vmem>>, %arg6: memref<4x20xf32, #tpu.memory_space<vmem>>) attributes {dimension_semantics = [#tpu.dimension_semantics<parallel>, #tpu.dimension_semantics<parallel>], iteration_bounds = array<i64: 2, 1>, scalar_prefetch = 0 : i64, scratch_operands = 1 : i64, tpu.core_type = #tpu.core_type<tc>, window_params = [{transform_indices = @transform_0, window_bounds = array<i64: 1, 4, 16>}, {pipeline_mode = #tpu.pipeline_mode<synchronous>, transform_indices = @transform_1, window_bounds = array<i64: 8, 12>}, {pipeline_mode = #tpu.pipeline_mode<synchronous>, transform_indices = @transform_2, window_bounds = array<i64: 8, 1>}, {transform_indices = @transform_3, window_bounds = array<i64: 1, 8, 16>}]} {
    %c0 = arith.constant 0 : index
    %c0_0 = arith.constant 0 : index
    %c0_1 = arith.constant 0 : index
    %0 = vector.load %arg2[%c0, %c0_0, %c0_1] : memref<1x4x16xf32, #tpu.memory_space<vmem>>, vector<1x4x16xf32>
    %1 = vector.shape_cast %0 : vector<1x4x16xf32> to vector<4x16xf32>
    %cst = arith.constant 0.000000e+00 : f32
    %2 = vector.broadcast %cst : f32 to vector<4x4xf32>
    %c0_2 = arith.constant 0 : index
    %c0_3 = arith.constant 0 : index
    %3 = vector.load %arg6[%c0_2, %c0_3] : memref<4x20xf32, #tpu.memory_space<vmem>>, vector<4x4xf32>
    tpu.vector_store %arg6[%c0_2, %c0_3], %2 {strides = array<i32>} : memref<4x20xf32, #tpu.memory_space<vmem>>, vector<4x4xf32>,
    %c0_4 = arith.constant 0 : index
    %c4 = arith.constant 4 : index
    %4 = vector.load %arg6[%c0_4, %c4] : memref<4x20xf32, #tpu.memory_space<vmem>>, vector<4x16xf32>
    tpu.vector_store %arg6[%c0_4, %c4], %1 {strides = array<i32>} : memref<4x20xf32, #tpu.memory_space<vmem>>, vector<4x16xf32>,
    %c0_5 = arith.constant 0 : index
    %c0_6 = arith.constant 0 : index
    %5 = vector.load %arg6[%c0_5, %c0_6] : memref<4x20xf32, #tpu.memory_space<vmem>>, vector<4x16xf32>
    %c0_7 = arith.constant 0 : index
    %c2 = arith.constant 2 : index
    %6 = vector.load %arg6[%c0_7, %c2] : memref<4x20xf32, #tpu.memory_space<vmem>>, vector<4x16xf32>
    %c0_8 = arith.constant 0 : index
    %c4_9 = arith.constant 4 : index
    %7 = vector.load %arg6[%c0_8, %c4_9] : memref<4x20xf32, #tpu.memory_space<vmem>>, vector<4x16xf32>
    %8 = tpu.concatenate %5, %6, %7 in 0 : vector<4x16xf32>, vector<4x16xf32>, vector<4x16xf32> -> vector<12x16xf32>
    %c0_10 = arith.constant 0 : index
    %c0_11 = arith.constant 0 : index
    %9 = vector.load %arg3[%c0_10, %c0_11] : memref<8x12xf32, #tpu.memory_space<vmem>>, vector<8x12xf32>
    %cst_12 = arith.constant dense<0.000000e+00> : vector<8x16xf32>
    %10 = tpu.matmul %9, %8, %cst_12 {dimension_numbers = #tpu.dot_dimension_numbers<[1], [0], [0], [1], [0, 0, 1, 1], [], []>} : vector<8x12xf32>, vector<12x16xf32>, vector<8x16xf32> -> vector<8x16xf32>
    %c0_13 = arith.constant 0 : index
    %c0_14 = arith.constant 0 : index
    %11 = vector.load %arg4[%c0_13, %c0_14] : memref<8x1xf32, #tpu.memory_space<vmem>>, vector<8x1xf32>
    %12 = vector.broadcast %11 : vector<8x1xf32> to vector<8x16xf32>
    %13 = arith.addf %10, %12 : vector<8x16xf32>
    %c0_15 = arith.constant 0 : index
    %c0_16 = arith.constant 0 : index
    %c0_17 = arith.constant 0 : index
    %14 = vector.load %arg5[%c0_15, %c0_16, %c0_17] : memref<1x8x16xf32, #tpu.memory_space<vmem>>, vector<1x8x16xf32>
    %15 = vector.shape_cast %14 : vector<1x8x16xf32> to vector<8x16xf32>
    %16 = vector.shape_cast %13 : vector<8x16xf32> to vector<1x8x16xf32>
    tpu.vector_store %arg5[%c0_15, %c0_16, %c0_17], %16 {strides = array<i32>} : memref<1x8x16xf32, #tpu.memory_space<vmem>>, vector<1x8x16xf32>,
    return
  }
  func.func @transform_0(%arg0: i32, %arg1: i32) -> (i32, i32, i32) {
    %c0_i32 = arith.constant 0 : i32
    %c0_i32_0 = arith.constant 0 : i32
    return %arg0, %c0_i32, %arg1 : i32, i32, i32
  }
  func.func @transform_1(%arg0: i32, %arg1: i32) -> (i32, i32) {
    %c0_i32 = arith.constant 0 : i32
    %c0_i32_0 = arith.constant 0 : i32
    %c0_i32_1 = arith.constant 0 : i32
    return %c0_i32, %c0_i32_0 : i32, i32
  }
  func.func @transform_2(%arg0: i32, %arg1: i32) -> (i32, i32) {
    %c0_i32 = arith.constant 0 : i32
    %c0_i32_0 = arith.constant 0 : i32
    %c0_i32_1 = arith.constant 0 : i32
    return %c0_i32, %c0_i32_0 : i32, i32
  }
  func.func @transform_3(%arg0: i32, %arg1: i32) -> (i32, i32, i32) {
    %c0_i32 = arith.constant 0 : i32
    %c0_i32_0 = arith.constant 0 : i32
    return %arg0, %c0_i32, %arg1 : i32, i32, i32
  }
}

</mosaic_0001>

<bundles_post_ra>
// kernel: tpu_custom_call.1
= control target key start
LH: loop header
LB: loop body
LE: loop exit
PB: predicated region body
PF: predicated region fallthrough
CT: control target
= control target key end

     0   :  { %8 = vsyncpa [#allocation4], 0  ;;  %s691_s0 = inlined_call_operand.vmem [shape: f32[2,4,16], index: 0, kind: input, shape index: {}]   ;;  %s692_s1 = inlined_call_operand.hbm [shape: f32[8,12], index: 1, kind: input, shape index: {}]   ;;  %s693_s2 = inlined_call_operand.vmem [shape: f32[8,1], index: 2, kind: input, shape index: {}]   ;;  %s694_s3 = inlined_call_operand.hbm [shape: f32[2,8,16], index: 3, kind: output, shape index: {}]  }
   0x1   :  { %9 = vsyncpa [#allocation5], 0 }
   0x2   :  { %11 = vsyncpa [#allocation5 + $0x1], 0  ;;  %s588_s12 = smov 0   ;;  %s590_s13 = smov 0  }
   0x3   :  { %s592_s14 = smov 0   ;;  %s594_s15 = smov 0  }
   0x4   :  { %s596_s16 = smov 0   ;;  %s598_s17 = smov 0  }
   0x5 LB: > { %s360_s18 = sadd.s32 4294967295, %s560_s17   ;;  %s361_s19 = sadd.s32 4294967294, %s560_s17   ;;  %s560_s17 = sphi %s598_s17, %s17_s17   ;;  %s556_s16 = sphi %s596_s16, %s701_s16   ;;  %s552_s15 = sphi %s594_s15, %s700_s15   ;;  %s548_s14 = sphi %s592_s14, %s699_s14   ;;  %s544_s13 = sphi %s590_s13, %s698_s13   ;;  %s540_s12 = sphi %s588_s12, %s697_s12  }
   0x6   : > { %s29_s20 = sadd.s32 1, %s556_s16  ;;  %s108_s21 = sadd.s32 1, %s548_s14 }
   0x7   : > { %p31_p0 = scmp.ge.s32.totalorder %s29_s20, 2  ;;  %p118_p1 = scmp.ne.s32.totalorder %s548_s14, %s544_s13 }
   0x8   : > { %p119_p2 = scmp.eq.s32.totalorder %s360_s18, 1  ;;  %p124_p3 = scmp.ne.s32.totalorder %s544_s13, %s540_s12 }
   0x9   : > { %s703_s20 = smov (%p31_p0, %s29_s20), 0  ;;  %p125_p5 = scmp.eq.s32.totalorder %s361_s19, 1 }
   0xa   : > { %p628_p4 = por %p119_p2, %p118_p1  ;;  %s103_s23 = ssub.s32 %s556_s16, %s703_s20 }
   0xb   : > { %p362_p6 = scmp.ge.s32.totalorder %s560_s17, 1  ;;  %p106_p7 = scmp.eq.s32.totalorder %s103_s23, 0 }
   0xc   : > { %p635_p8 = por %p125_p5, %p124_p3  ;;  %p132_p9 = scmp.lt.s32.totalorder %s560_s17, 3 }
   0xd   : > { %s641_s25 = scalar_select %p106_p7, %s548_s14, %s108_s21  }
   0xe   : > { %p133_p10 = pnand %p362_p6, %p132_p9  ;;  %p389_p11 = scmp.eq.s32.totalorder %s360_s18, 0 }
   0xf   : > { %s144_s28 = sshll.u32 %s692_s1, 4  ;;  %s562_s29 = smov [#allocation3]   ;;  %s145_s28 = int_to_ptr.hbm [resolvable:$true] %s144_s28 }
  0x10   : > { %p381_p12 = pneg %p133_p10  ;;  %s146_s30 = sshll.u32 %s562_s29, 4  ;;  %s147_s30 = int_to_ptr.vmem [resolvable:$true] %s146_s30 }
  0x11   : > { %172 = sbr.rel (%p133_p10) target bundleno = 403 (0x193), region = 32 }
  0x12   : > { %p382_p13 = pnand %p389_p11, %p381_p12 }
  0x14   : > { %384 = dma.hbm_to_vmem [thread:$0]  (!%p382_p13), %s145_s28, 128, %s147_s30, [#allocation4]  }
  0x16   : > { %531 = dma.done.wait (%p389_p11), [#allocation4], 128  }
  0x17   : > { %533 = vsyncadd (%p389_p11), [#allocation4], 4294967168  ;;  %p199_p0 = scmp.lt.s32.totalorder %s552_s15, 1  ;;  %vm207_vm0 = vcmask 27648   ;;  %v563_v0 = vmov 0.0   ;;  %s564_s9 = smov 4  }
  0x18   : > { %208 = vst.msk [vmem:[#allocation2] sm:$0xf] %vm207_vm0, %v563_v0  ;;  %vm213_vm1 = vcmask 158752   ;;  %s565_s10 = smov 124   ;;  %s566_s11 = smov 126   ;;  %v226_v5 = vld [vmem:[%s693_s2] sm:$0xff] }
  0x19   : > { %s200_s4 = scalar_select %p199_p0, %s552_s15, 1  ;;  %v567_v6 = vmov 0   ;;  %vm223_vm2 = vcmask 1043456   ;;  %v225_v9 = vld [vmem:[#allocation3] sm:$0xff]  ;;  %vm232_vm3 = vcmask 97280   ;;  %vm258_vm4 = vcmask 130048  }
  0x1a   : > { %446 = vset.pattern.permute.xlu1 %v567_v6  ;;  %447 = vset.pattern.permute.xlu0 %v567_v6  ;;  %s196_s21 = sand.u32 1, %s544_s13   ;;  %s372_s26 = sshll.u32 %s552_s15, 3 }
  0x1b   : > { %s368_s5 = sshll.u32 %s200_s4, 2  ;;  %s367_s23 = sshll.u32 %s196_s21, 3 }
  0x1c   : > { %s205_s8 = scalar_lea.vmem %s691_s0, %s368_s5  ;;  %s272_s29 = scalar_lea.hbm %s694_s3, %s372_s26 }
  0x1d   : > { %v206_v1 = vld [vmem:[%s205_s8] sm:$0xf]  ;;  %s198_s30 = scalar_lea.vmem [#allocation6], %s367_s23  ;;  %s276_s5 = sshll.u32 %s272_s29, 4  ;;  %s277_s5 = int_to_ptr.hbm [resolvable:$true] %s276_s5 }
  0x1e   : > { %210 = vrot.lane.b32.xlu0 %v206_v1, %s564_s9  ;;  %s274_s4 = sshll.u32 %s198_s30, 4  ;;  %s261_s6 = scalar_lea.sflag [#allocation5], %s196_s21  ;;  %s275_s4 = int_to_ptr.vmem [resolvable:$true] %s274_s4 }
  0x1f   : > { %s492_s7 = sshra.s32 %s277_s5, 4  ;;  %s493_s7 = int_to_ptr.hbm [resolvable:$true] %s492_s7 }
  0x20   : > { %s494_s8 = scalar_lea.hbm %s493_s7, 8  ;;  %p499_p5 = scmp.lt.s32.totalorder %s493_s7, %s694_s3 }
  0x21   : > { %p495_p1 = scmp.ne.s32.totalorder %s493_s7, %s494_s8 }
  0x23   : > { %p496_p2 = pnand %p495_p1, %p628_p4 }
  0x25   : > { %p497_p3 = pneg %p496_p2 }
  0x90   : > { %v211_v2 = vpop.permute.xlu0 %210 }
  0x91   : > { %214 = vst.msk [vmem:[#allocation2] sm:$0xf] %vm213_vm1, %v211_v2 }
  0x98   : > { %v215_v3 = vld [vmem:[#allocation2] sm:$0xf] }
  0x99   : > { %221 = vrot.lane.b32.xlu0 %v215_v3, %s565_s10  ;;  %v217_v4 = vrot.slane %v215_v3, 4  ;;  %s498_s10 = scalar_lea.hbm %s694_s3, 16 }
  0x9a   : > { %p500_p6 = scmp.lt.s32.totalorder %s498_s10, %s494_s8 }
  0x9b   : > { %218 = vrot.lane.b32.xlu1 %v217_v4, %s566_s11 }
  0x9c   : > { %p501_p7 = por %p500_p6, %p499_p5 }
  0x9e   : > { %p502_p9 = pnand %p501_p7, %p497_p3 }
  0xa3   : > { %229 = vperm.xlu1 %446, %v226_v5  }
 0x10b   : > { %v222_v7 = vpop.permute.xlu0 %221 }
 0x10c   : > { %369 = vmatpush.msk.msra.mxu0 %vm223_vm2, %v222_v7 }
 0x10d   : > { %v219_v8 = vpop.permute.xlu1 %218 }
 0x10e   : > { %v224_v10 = vsel %vm223_vm2, %v215_v3, %v219_v8 }
 0x10f   : > { %253 = vmatpush.msra.mxu0 %v224_v10 }
 0x110   : > { %370 = vmatmul.msk.f32.vlgmr.msra.gmra.mxu0 %vm232_vm3, %v225_v9 }
 0x115   : > { %v230_v11 = vpop.permute.xlu1 %229 }
 0x18d   : > { %v255_v12 = vpop.f32.mrf.mxu0 }
 0x18e   : > { %v256_v13 = vadd.f32 %v255_v12, %v230_v11 }
 0x190   : > { %259 = vst.msk [vmem:[%s198_s30] sm:$0xff] %vm258_vm4, %v256_v13 }
 0x191   : > { %505 = shalt.err (!%p502_p9)
}
 0x192   : > { %379 = dma.vmem_to_hbm [thread:$0]  (%p628_p4), %s275_s4, 128, %s277_s5, %s261_s6  }
 0x193 PF: > { %p391_p10 = scmp.ge.s32.totalorder %s560_s17, 2  ;;  %s288_s19 = sand.u32 1, %s540_s12  }
 0x194   : > { %s289_s21 = scalar_lea.sflag [#allocation5], %s288_s19 }
 0x195   : > { %p386_p11 = pnand %p391_p10, %p635_p8 }
 0x197   : > { %p387_p12 = pneg %p386_p11 }
 0x199   : > { %535 = dma.done.wait (%p387_p12), %s289_s21, 128  }
 0x19a   : > { %537 = vsyncadd (%p387_p12), %s289_s21, 4294967168  ;;  %s17_s17 = sadd.s32 1, %s560_s17   ;;  %s697_s12 = smov %s544_s13 }
 0x19b   : > { %p14_p13 = scmp.ge.s32.totalorder %s17_s17, 4   ;;  %s698_s13 = smov %s548_s14 }
 0x19c   : > { %s699_s14 = smov %s641_s25  ;;  %s700_s15 = smov %s556_s16 }
 0x19d   : > { %s701_s16 = smov %s703_s20  ;;  %16 = sbr.rel (!%p14_p13) target bundleno = 5 (0x5), region = 72 }
 0x1a2   :  { %295 = vsyncpa [#allocation4], 1 }
 0x1a3   :  { %297 = vsyncpa [#allocation4 + $0x1], 1 }
 0x1a4   :  { %298 = vsyncpa [#allocation5], 1 }
 0x1a5   :  { %300 = vsyncpa [#allocation5 + $0x1], 1 }

</bundles_post_ra>
